<compile_context>
chip_gen: v7x
topology: tpu7x:2x2x1
jax: 0.10.0
libtpu: 0.0.40
codegen_flags: <defaults>
</compile_context>

<pallas_src>
import functools

import jax
import jax.numpy as jnp
from jax.experimental import pallas as pl
from jax.experimental.pallas import tpu as pltpu


# ----------------------------- kernels --------------------------------------

def _make_unfused_kernel(compute_dtype):
    """out[P, tn] = tanh(x @ w1 + b1) @ w2_tile + b2_tile  (E < 128 fallback)."""
    cd = jnp.dtype(compute_dtype)

    def kernel(x_ref, w1_ref, b1_ref, w2_ref, b2_ref, o_ref):
        # h recomputed per tile: rides in idle MXU/EUP slots of a DMA-bound kernel.
        acc1 = jnp.dot(x_ref[...].astype(cd), w1_ref[...].astype(cd),
                       preferred_element_type=jnp.float32)
        h = jnp.tanh(acc1 + b1_ref[...]).astype(cd)
        acc2 = jnp.dot(h, w2_ref[...].astype(cd),
                       preferred_element_type=jnp.float32)
        o_ref[...] = (acc2 + b2_ref[...]).astype(o_ref.dtype)

    return kernel


def _make_fused_permute_kernel(compute_dtype, g_tile, e):
    """Same math, but stores directly in the permuted (group, P, E) layout."""
    cd = jnp.dtype(compute_dtype)

    def kernel(x_ref, w1_ref, b1_ref, w2_ref, b2_ref, o_ref):
        acc1 = jnp.dot(x_ref[...].astype(cd), w1_ref[...].astype(cd),
                       preferred_element_type=jnp.float32)
        h = jnp.tanh(acc1 + b1_ref[...]).astype(cd)
        # Per-group (lane-dense, 128-aligned) matmuls write the output already
        # permuted -> no XLA transpose of the (P, d_out) tensor afterwards.
        for g in range(g_tile):               # static, bounded (g_tile <= 32)
            lo = g * e
            w2g = w2_ref[:, lo:lo + e].astype(cd)
            acc = jnp.dot(h, w2g, preferred_element_type=jnp.float32)
            o_ref[g] = (acc + b2_ref[:, lo:lo + e]).astype(o_ref.dtype)

    return kernel


# ----------------------------- helpers --------------------------------------

def _vmem_capacity_bytes():
    try:
        return int(pltpu.get_tpu_info().vmem_capacity_bytes)
    except Exception:
        return 64 << 20  # conservative fallback (v7x per-TensorCore VMEM)


def _round_down(x, m):
    return (x // m) * m


def _round_up(x, m):
    return -(-x // m) * m


def _select_tile_n(d_out, *, quantum, p_pad, input_size, bottleneck,
                   w_itemsize, out_itemsize, vmem_cap, tile_n=None):
    """Pick the d_out tile from the VMEM budget (no strict-divisor collapse)."""
    d_pad = _round_up(d_out, quantum)
    if tile_n is not None:
        tn = _round_down(tile_n, quantum) or quantum
        return max(quantum, min(tn, d_pad))
    budget = max(int(0.45 * vmem_cap), 16 << 20)
    # Resident inputs (wte, w1, b1); conservatively counted double-buffered.
    resident = 2 * 4 * (p_pad * input_size + input_size * bottleneck
                        + 8 * _round_up(bottleneck, 128))
    # Per-lane-column cost of the streamed tensors (w2 + b2 + out), x2 buffers.
    per_col = 2 * (bottleneck * w_itemsize + 8 * 4 + p_pad * out_itemsize)
    tn = (budget - resident) // max(per_col, 1)
    tn = _round_down(tn, quantum)
    if d_pad >= 4 * quantum:  # keep >= 4 grid steps (megacore load balance)
        tn = min(tn, max(_round_down(pl.cdiv(d_pad, 4), quantum), quantum))
    return max(quantum, min(tn, d_pad))


# ----------------------------- forward --------------------------------------

def prefix_tuning_forward(batch_size, wte, w1, b1, w2, b2, *,
                          n_layers, n_heads, input_size, prefix_length,
                          compute_dtype=jnp.bfloat16, out_dtype=None,
                          tile_n=None, broadcast_batch=True):
    """Reproduces PrefixTuning.forward(batch_size) (eval mode).

    Returns a tuple of n_layers arrays, each of shape
    (2, batch, n_heads, prefix_length, n_embd_per_head); batch == 1 when
    broadcast_batch=False.  Weights stream in their at-rest dtype and are cast
    to `compute_dtype` inside the kernel (pass bf16-at-rest weights for the
    lowest HBM traffic).
    """
    E = input_size // n_heads
    bottleneck = w1.shape[1]
    d_out = n_layers * 2 * input_size
    P = prefix_length
    cd = jnp.dtype(compute_dtype)
    od = jnp.dtype(out_dtype) if out_dtype is not None else cd

    b1f = jnp.asarray(b1, jnp.float32).reshape(1, bottleneck)
    b2f = jnp.asarray(b2, jnp.float32).reshape(1, d_out)

    # Fuse the (P,2L,H,E) -> (2L,H,P,E) permute into the kernel only when E is
    # lane-dense; otherwise a sub-128-lane output block forces masked stores.
    fuse_permute = (E % 128 == 0)
    quantum = E if fuse_permute else 128

    vmem_cap = _vmem_capacity_bytes()
    p_pad = _round_up(P, 8)
    w_itemsize = jnp.dtype(w2.dtype).itemsize
    tn = _select_tile_n(d_out, quantum=quantum, p_pad=p_pad,
                        input_size=input_size, bottleneck=bottleneck,
                        w_itemsize=w_itemsize, out_itemsize=od.itemsize,
                        vmem_cap=vmem_cap, tile_n=tile_n)
    if fuse_permute:
        tn = min(tn, 32 * E)  # bound the unrolled per-group loop
    grid = (pl.cdiv(d_out, tn),)

    per_step = (bottleneck * tn * w_itemsize + 8 * tn * 4
                + p_pad * tn * od.itemsize)
    resident = 4 * (p_pad * input_size + input_size * bottleneck
                    + 8 * _round_up(bottleneck, 128))
    vmem_limit = int(1.5 * (2 * resident + 2 * per_step))
    vmem_limit = int(min(max(vmem_limit, 32 << 20), 0.85 * vmem_cap))

    in_specs = [
        pl.BlockSpec((P, input_size), lambda j: (0, 0)),           # wte (resident)
        pl.BlockSpec((input_size, bottleneck), lambda j: (0, 0)),  # w1  (resident)
        pl.BlockSpec((1, bottleneck), lambda j: (0, 0)),           # b1  (resident)
        pl.BlockSpec((bottleneck, tn), lambda j: (0, j)),          # w2  (streams)
        pl.BlockSpec((1, tn), lambda j: (0, j)),                   # b2  (streams)
    ]
    cparams = pltpu.CompilerParams(dimension_semantics=("parallel",),
                                   vmem_limit_bytes=vmem_limit)

    if fuse_permute:
        g_tile = tn // E
        out = pl.pallas_call(
            _make_fused_permute_kernel(cd, g_tile, E),
            out_shape=jax.ShapeDtypeStruct((n_layers * 2 * n_heads, P, E), od),
            grid_spec=pltpu.PrefetchScalarGridSpec(
                num_scalar_prefetch=0, grid=grid, in_specs=in_specs,
                out_specs=pl.BlockSpec((g_tile, P, E), lambda j: (j, 0, 0))),
            compiler_params=cparams,
        )(wte, w1, b1f, w2, b2f)
        kv = out.reshape(n_layers * 2, n_heads, P, E)        # free (leading dims)
    else:
        out = pl.pallas_call(
            _make_unfused_kernel(cd),
            out_shape=jax.ShapeDtypeStruct((P, d_out), od),
            grid_spec=pltpu.PrefetchScalarGridSpec(
                num_scalar_prefetch=0, grid=grid, in_specs=in_specs,
                out_specs=pl.BlockSpec((P, tn), lambda j: (0, j))),
            compiler_params=cparams,
        )(wte, w1, b1f, w2, b2f)
        kv = out.reshape(P, n_layers * 2, n_heads, E)
        kv = jnp.transpose(kv, (1, 2, 0, 3))                  # (2L, H, P, E)

    # dropout: eval-mode identity.
    # TODO(synk): training-mode dropout (p > 0) is not implemented.
    kv = kv[:, None]                                          # (2L, 1, H, P, E)
    if broadcast_batch:
        # TODO(synk): prefer broadcast_batch=False and broadcast lazily in the
        # attention consumer; materializing B copies dominates HBM traffic.
        kv = jnp.broadcast_to(kv, (n_layers * 2, batch_size, n_heads, P, E))
    return tuple(kv[2 * l:2 * l + 2] for l in range(n_layers))


# ----------------------------- reference ------------------------------------

def _reference(batch_size, wte, w1, b1, w2, b2, *,
               n_layers, n_heads, input_size, prefix_length):
    n_embd_per_head = input_size // n_heads
    dot = functools.partial(jnp.dot, precision=jax.lax.Precision.HIGHEST)
    embs = jnp.broadcast_to(wte[None], (batch_size, prefix_length, input_size))
    h = jnp.tanh(dot(embs, w1) + b1.reshape(-1))
    y = dot(h, w2) + b2.reshape(-1)
    kv = y.reshape(batch_size, prefix_length, n_layers * 2, n_heads,
                   n_embd_per_head)
    kv = jnp.transpose(kv, (2, 0, 3, 1, 4))
    return tuple(kv[2 * l:2 * l + 2] for l in range(n_layers))


# ----------------------------- test -----------------------------------------

def _make_params(key, prefix_length, input_size, bottleneck, d_out):
    k_wte, k_w1, k_b1, k_w2, k_b2 = jax.random.split(key, 5)
    wte = jax.random.normal(k_wte, (prefix_length, input_size), jnp.float32) * 0.02
    w1 = jax.random.normal(k_w1, (input_size, bottleneck), jnp.float32) * 0.02
    b1 = jax.random.normal(k_b1, (1, bottleneck), jnp.float32) * 0.02
    w2 = jax.random.normal(k_w2, (bottleneck, d_out), jnp.float32) * 0.02
    b2 = jax.random.normal(k_b2, (1, d_out), jnp.float32) * 0.02
    return wte, w1, b1, w2, b2


def _run_config(key, *, n_layers, n_heads, input_size, prefix_length,
                bottleneck, batch_size, tile_n):
    d_out = n_layers * 2 * input_size
    n_embd_per_head = input_size // n_heads
    wte, w1, b1, w2, b2 = _make_params(key, prefix_length, input_size,
                                       bottleneck, d_out)
    common = dict(n_layers=n_layers, n_heads=n_heads,
                  input_size=input_size, prefix_length=prefix_length)

    out_bf16 = prefix_tuning_forward(batch_size, wte, w1, b1, w2, b2,
                                     compute_dtype=jnp.bfloat16,
                                     tile_n=tile_n, **common)
    out_f32 = prefix_tuning_forward(batch_size, wte, w1, b1, w2, b2,
                                    compute_dtype=jnp.float32,
                                    tile_n=tile_n, **common)
    out_bf16 = jax.block_until_ready(out_bf16)
    out_f32 = jax.block_until_ready(out_f32)

    ref = _reference(batch_size, wte, w1, b1, w2, b2, **common)

    expected_shape = (2, batch_size, n_heads, prefix_length, n_embd_per_head)
    assert len(out_bf16) == n_layers and len(out_f32) == n_layers
    for o32, obf, r in zip(out_f32, out_bf16, ref):
        assert o32.shape == expected_shape
        assert obf.shape == expected_shape
        assert jnp.allclose(o32, r, atol=1e-4, rtol=1e-4)          # f32 parity
        assert jnp.allclose(obf.astype(jnp.float32), r,
                            atol=1e-3, rtol=2e-2)                   # bf16 path


if __name__ == "__main__":
    key = jax.random.PRNGKey(0)
    k_a, k_b = jax.random.split(key, 2)

    # Config A: E = 32 (< 128) exercises the unfused (P, d_out) fallback path.
    # d_out = 1024, tile_n=256 -> 4 grid steps.
    _run_config(k_a, n_layers=4, n_heads=4, input_size=128, prefix_length=8,
                bottleneck=64, batch_size=2, tile_n=256)

    # Config B: E = 128 exercises the fused pre-permuted (2L*H, P, E) path.
    # d_out = 1024, tile_n=256 -> g_tile=2 groups/step, 4 grid steps.
    _run_config(k_b, n_layers=2, n_heads=2, input_size=256, prefix_length=8,
                bottleneck=128, batch_size=2, tile_n=256)

    print("KERNEL_OK")
</pallas_src>

<mosaic_0001>
module attributes {stable_mosaic.version = 11 : i64} {
  func.func @kernel(%arg0: i32, %arg1: memref<8x128xf32, #tpu.memory_space<vmem>>, %arg2: memref<128x64xf32, #tpu.memory_space<vmem>>, %arg3: memref<1x64xf32, #tpu.memory_space<vmem>>, %arg4: memref<64x256xf32, #tpu.memory_space<vmem>>, %arg5: memref<1x256xf32, #tpu.memory_space<vmem>>, %arg6: memref<8x256xbf16, #tpu.memory_space<vmem>>) attributes {dimension_semantics = [#tpu.dimension_semantics<parallel>], iteration_bounds = array<i64: 4>, scalar_prefetch = 0 : i64, scratch_operands = 0 : i64, tpu.core_type = #tpu.core_type<tc>, window_params = [{pipeline_mode = #tpu.pipeline_mode<synchronous>, transform_indices = @transform_0, window_bounds = array<i64: 8, 128>}, {pipeline_mode = #tpu.pipeline_mode<synchronous>, transform_indices = @transform_1, window_bounds = array<i64: 128, 64>}, {pipeline_mode = #tpu.pipeline_mode<synchronous>, transform_indices = @transform_2, window_bounds = array<i64: 1, 64>}, {transform_indices = @transform_3, window_bounds = array<i64: 64, 256>}, {transform_indices = @transform_4, window_bounds = array<i64: 1, 256>}, {transform_indices = @transform_5, window_bounds = array<i64: 8, 256>}]} {
    %c0 = arith.constant 0 : index
    %c0_0 = arith.constant 0 : index
    %0 = vector.load %arg1[%c0, %c0_0] : memref<8x128xf32, #tpu.memory_space<vmem>>, vector<8x128xf32>
    %1 = arith.truncf %0 : vector<8x128xf32> to vector<8x128xbf16>
    %c0_1 = arith.constant 0 : index
    %c0_2 = arith.constant 0 : index
    %2 = vector.load %arg2[%c0_1, %c0_2] : memref<128x64xf32, #tpu.memory_space<vmem>>, vector<128x64xf32>
    %3 = arith.truncf %2 : vector<128x64xf32> to vector<128x64xbf16>
    %cst = arith.constant dense<0.000000e+00> : vector<8x64xf32>
    %4 = tpu.matmul %1, %3, %cst {dimension_numbers = #tpu.dot_dimension_numbers<[1], [0], [0], [1], [0, 0, 1, 1], [], []>} : vector<8x128xbf16>, vector<128x64xbf16>, vector<8x64xf32> -> vector<8x64xf32>
    %c0_3 = arith.constant 0 : index
    %c0_4 = arith.constant 0 : index
    %5 = vector.load %arg3[%c0_3, %c0_4] : memref<1x64xf32, #tpu.memory_space<vmem>>, vector<1x64xf32>
    %6 = vector.broadcast %5 : vector<1x64xf32> to vector<8x64xf32>
    %7 = arith.addf %4, %6 : vector<8x64xf32>
    %8 = math.tanh %7 : vector<8x64xf32>
    %9 = arith.truncf %8 : vector<8x64xf32> to vector<8x64xbf16>
    %c0_5 = arith.constant 0 : index
    %c0_6 = arith.constant 0 : index
    %10 = vector.load %arg4[%c0_5, %c0_6] : memref<64x256xf32, #tpu.memory_space<vmem>>, vector<64x256xf32>
    %11 = arith.truncf %10 : vector<64x256xf32> to vector<64x256xbf16>
    %cst_7 = arith.constant dense<0.000000e+00> : vector<8x256xf32>
    %12 = tpu.matmul %9, %11, %cst_7 {dimension_numbers = #tpu.dot_dimension_numbers<[1], [0], [0], [1], [0, 0, 1, 1], [], []>} : vector<8x64xbf16>, vector<64x256xbf16>, vector<8x256xf32> -> vector<8x256xf32>
    %c0_8 = arith.constant 0 : index
    %c0_9 = arith.constant 0 : index
    %13 = vector.load %arg5[%c0_8, %c0_9] : memref<1x256xf32, #tpu.memory_space<vmem>>, vector<1x256xf32>
    %14 = vector.broadcast %13 : vector<1x256xf32> to vector<8x256xf32>
    %15 = arith.addf %12, %14 : vector<8x256xf32>
    %16 = arith.truncf %15 : vector<8x256xf32> to vector<8x256xbf16>
    %c0_10 = arith.constant 0 : index
    %c0_11 = arith.constant 0 : index
    %17 = vector.load %arg6[%c0_10, %c0_11] : memref<8x256xbf16, #tpu.memory_space<vmem>>, vector<8x256xbf16>
    tpu.vector_store %arg6[%c0_10, %c0_11], %16 {strides = array<i32>} : memref<8x256xbf16, #tpu.memory_space<vmem>>, vector<8x256xbf16>,
    return
  }
  func.func @transform_0(%arg0: i32) -> (i32, i32) {
    %c0_i32 = arith.constant 0 : i32
    %c0_i32_0 = arith.constant 0 : i32
    %c0_i32_1 = arith.constant 0 : i32
    return %c0_i32, %c0_i32_0 : i32, i32
  }
  func.func @transform_1(%arg0: i32) -> (i32, i32) {
    %c0_i32 = arith.constant 0 : i32
    %c0_i32_0 = arith.constant 0 : i32
    %c0_i32_1 = arith.constant 0 : i32
    return %c0_i32, %c0_i32_0 : i32, i32
  }
  func.func @transform_2(%arg0: i32) -> (i32, i32) {
    %c0_i32 = arith.constant 0 : i32
    %c0_i32_0 = arith.constant 0 : i32
    %c0_i32_1 = arith.constant 0 : i32
    return %c0_i32, %c0_i32_0 : i32, i32
  }
  func.func @transform_3(%arg0: i32) -> (i32, i32) {
    %c0_i32 = arith.constant 0 : i32
    %c0_i32_0 = arith.constant 0 : i32
    return %c0_i32, %arg0 : i32, i32
  }
  func.func @transform_4(%arg0: i32) -> (i32, i32) {
    %c0_i32 = arith.constant 0 : i32
    %c0_i32_0 = arith.constant 0 : i32
    return %c0_i32, %arg0 : i32, i32
  }
  func.func @transform_5(%arg0: i32) -> (i32, i32) {
    %c0_i32 = arith.constant 0 : i32
    %c0_i32_0 = arith.constant 0 : i32
    return %c0_i32, %arg0 : i32, i32
  }
}

</mosaic_0001>

<bundles_post_ra>
// kernel: tpu_custom_call.1
= control target key start
LH: loop header
LB: loop body
LE: loop exit
PB: predicated region body
PF: predicated region fallthrough
CT: control target
= control target key end

     0   :  { %10 = vsyncpa [#allocation3], 0  ;;  %s1001_s0 = inlined_call_operand.vmem [shape: f32[8,128], index: 0, kind: input, shape index: {}]   ;;  %s1002_s1 = inlined_call_operand.vmem [shape: f32[128,64], index: 1, kind: input, shape index: {}]   ;;  %s1003_s2 = inlined_call_operand.vmem [shape: f32[1,64], index: 2, kind: input, shape index: {}]   ;;  %s1004_s3 = inlined_call_operand.hbm [shape: f32[64,1024], index: 3, kind: input, shape index: {}]   ;;  %s1005_s4 = inlined_call_operand.vmem [shape: f32[1,1024], index: 4, kind: input, shape index: {}]   ;;  %s1006_s5 = inlined_call_operand.hbm [shape: bf16[8,1024], index: 5, kind: output, shape index: {}]  }
   0x1   :  { %12 = vsyncpa [#allocation3 + $0x1], 0 }
   0x2   :  { %13 = vsyncpa [#allocation4], 0 }
   0x3   :  { %15 = vsyncpa [#allocation4 + $0x1], 0  ;;  %s764_s18 = smov 0   ;;  %s766_s19 = smov 0  }
   0x4   :  { %s768_s20 = smov 0   ;;  %s770_s21 = smov 0  }
   0x5 LB: > { %s785_s22 = sadd.s32 4294967295, %s724_s21   ;;  %s524_s23 = sadd.s32 4294967294, %s724_s21   ;;  %s724_s21 = sphi %s770_s21, %s1019_s21   ;;  %s720_s20 = sphi %s768_s20, %s1018_s20   ;;  %s716_s19 = sphi %s766_s19, %s1017_s19   ;;  %s712_s18 = sphi %s764_s18, %s1016_s18  }
   0x6   : > { %s789_s24 = sadd.s32 1, %s724_s21   ;;  %s91_s25 = sadd.s32 1, %s720_s20 }
   0x7   : > { %s88_s26 = ssub.s32 %s724_s21, %s789_s24  ;;  %p98_p0 = scmp.ne.s32.totalorder %s720_s20, %s716_s19 }
   0x8   : > { %p89_p1 = scmp.eq.s32.totalorder %s88_s26, 0  ;;  %p99_p2 = scmp.eq.s32.totalorder %s724_s21, 0 }
   0x9   : > { %p104_p3 = scmp.ne.s32.totalorder %s716_s19, %s712_s18  ;;  %p105_p4 = scmp.eq.s32.totalorder %s785_s22, 0 }
   0xa   : > { %s801_s27 = scalar_select %p89_p1, %s720_s20, %s91_s25  }
   0xb   : > { %p803_p5 = por %p99_p2, %p98_p0  ;;  %p807_p6 = por %p105_p4, %p104_p3 }
   0xc   : > { %p154_p7 = scmp.eq.s32.totalorder %s785_s22, 3  ;;  %p160_p8 = scmp.eq.s32.totalorder %s524_s23, 3 }
   0xd   : > { %p586_p9 = scmp.lt.s32.totalorder %s724_s21, 4  ;;  %s189_s7 = sand.u32 1, %s720_s20  }
   0xe   : > { %p813_p10 = por %p154_p7, %p98_p0  ;;  %p817_p11 = por %p160_p8, %p104_p3 }
   0xf   : > { %s542_s8 = sshll.u32 %s724_s21, 8  ;;  %s527_s9 = sshll.u32 %s189_s7, 7 }
  0x10   : > { %s1010_s30 = scalar_select %p813_p10, 1, 0 }
  0x11   : > { %s1011_s6 = scalar_select %p817_p11, 1, 0 }
  0x12   : > { %s826_s12 = scalar_lea.hbm %s1004_s3, %s542_s8  ;;  %s193_s13 = scalar_lea.vmem [#allocation2], %s527_s9 }
  0x13   : > { %s200_s14 = sshll.u32 %s193_s13, 4  ;;  %p830_p12 = pnand %p586_p9, %p803_p5  ;;  %s834_s14 = int_to_ptr.vmem [resolvable:$true] %s200_s14 }
  0x14   : > { %s837_s16 = scalar_lea.sflag [#allocation3], %s189_s7  ;;  %s628_s17 = scalar_lea.hbm %s826_s12, 2048 }
  0x15   : > { %p629_p0 = scmp.ne.s32.totalorder %s826_s12, %s628_s17  ;;  %p630_p1 = pneg %p830_p12 }
  0x16   : > { %s633_s26 = scalar_lea.hbm %s1004_s3, 8192  ;;  %p634_p4 = scmp.lt.u32.totalorder %s826_s12, %s1004_s3 }
  0x17   : > { %p631_p2 = pnand %p630_p1, %p629_p0  ;;  %p635_p5 = scmp.lt.u32.totalorder %s633_s26, %s628_s17 }
  0x18   : > { %p637_p8 = scmp.lt.u32.totalorder %s628_s17, %s826_s12 }
  0x19   : > { %p632_p3 = pneg %p631_p2  ;;  %p636_p7 = por %p635_p5, %p634_p4 }
  0x1b   : > { %p638_p9 = por %p637_p8, %p636_p7 }
  0x1d   : > { %p639_p13 = pnand %p638_p9, %p632_p3 }
  0x1f   : > { %642 = shalt.err (!%p639_p13)
}
  0x20   : > { %s643_s7 = scalar_lea.vmem %s834_s14, 2048  ;;  %s726_s9 = smov [#allocation2]  }
  0x21   : > { %p644_p0 = scmp.ne.s32.totalorder %s834_s14, %s643_s7  ;;  %s648_s10 = sshll.u32 %s726_s9, 4  ;;  %s649_s10 = int_to_ptr.vmem [resolvable:$false] %s648_s10 }
  0x22   : > { %s650_s11 = scalar_lea.vmem %s649_s10, 4096  ;;  %p651_p10 = scmp.lt.s32.totalorder %s834_s14, %s649_s10 }
  0x23   : > { %p646_p2 = pnand %p644_p0, %p630_p1  ;;  %p652_p4 = scmp.lt.s32.totalorder %s650_s11, %s643_s7 }
  0x25   : > { %p647_p11 = pneg %p646_p2  ;;  %p653_p5 = por %p652_p4, %p651_p10 }
  0x27   : > { %p654_p7 = pnand %p653_p5, %p647_p11 }
  0x29   : > { %657 = shalt.err (!%p654_p7)
}
  0x2a   : > { %s727_s13 = smov 1024   ;;  %s728_s17 = smov 256  }
  0x2b   : > { %s729_s23 = smov 16   ;;  %p216_p13 = scmp.lt.s32.totalorder %s724_s21, 5 }
  0x2c   : > { %581 = dma.hbm_to_vmem [thread:$0]  (!%p830_p12), %s826_s12, 2048, %s834_s14, %s837_s16, %s727_s13, %s728_s17, %s729_s23  }
  0x2d   : > { %p1013_p1 = scmp.ge.s32.totalorder %s724_s21, 1 }
  0x2f   : > { %p217_p3 = pnand %p1013_p1, %p216_p13 }
  0x30   : > { %s869_s25 = sand.u32 (!%p217_p3), 1, %s716_s19  }
  0x31   : > { %220 = sbr.rel (%p217_p3) target bundleno = 549 (0x225), region = 40  ;;  %s531_s26 = sshll.u32 (!%p217_p3), %s869_s25, 7 }
  0x32   : > { %s223_s28 = scalar_lea.sflag (!%p217_p3), [#allocation3], %s869_s25  ;;  %s873_s8 = scalar_lea.vmem (!%p217_p3), [#allocation2], %s531_s26 }
  0x38   : > { %703 = dma.done.wait (%p807_p6), %s223_s28, 2048  }
  0x39   : > { %705 = vsyncadd (%p807_p6), %s223_s28, 4294965248  ;;  %v730_v0 = vmov 0.0   ;;  %vm731_vm0 = vmmov 0   ;;  %v267_v1 = vld [vmem:[%s1002_s1] sm:$0xff]  ;;  %v268_v2 = vld [vmem:[%s1002_s1 + $0x8] sm:$0xff]  ;;  %v732_v51 = vmov 0   ;;  %v366_v60 = vlaneseq }
  0x3a   : > { %554 = vmatprep.subr.bf16.mxu0 %v730_v0  ;;  %570 = vmatprep.mubr.msk.bf16.mxu0 %vm731_vm0, %v730_v0  ;;  %v269_v3 = vld [vmem:[%s1002_s1 + $0x10] sm:$0xff]  ;;  %v283_v4 = vpack.c.bf16 %v268_v2, %v267_v1  ;;  %v270_v5 = vld [vmem:[%s1002_s1 + $0x18] sm:$0xff]  ;;  %v271_v7 = vld [vmem:[%s1002_s1 + $0x20] sm:$0xff]  ;;  %vm376_vm1 = vcmask 523264   ;;  %s532_s23 = sshll.u32 %s869_s25, 3  ;;  %s544_s26 = sshll.u32 %s785_s22, 7 }
  0x3b   : > { %v284_v6 = vpack.c.bf16 %v270_v5, %v269_v3  ;;  %v272_v8 = vld [vmem:[%s1002_s1 + $0x28] sm:$0xff]  ;;  %v273_v10 = vld [vmem:[%s1002_s1 + $0x30] sm:$0xff]  ;;  %v274_v11 = vld [vmem:[%s1002_s1 + $0x38] sm:$0xff]  ;;  %412 = vmatprep.mubr.bf16.mxu1 %v732_v51  ;;  %v367_v61 = vshrl.u32 %v366_v60, 7  ;;  %s256_s28 = scalar_lea.vmem [#allocation5], %s532_s23  ;;  %s958_s16 = scalar_lea.hbm %s1006_s5, %s544_s26 }
  0x3c   : > { %555 = vmatpush3.bf16.msra.mxu0 %v283_v4  ;;  %v285_v9 = vpack.c.bf16 %v272_v8, %v271_v7  ;;  %v286_v12 = vpack.c.bf16 %v274_v11, %v273_v10  ;;  %v275_v13 = vld [vmem:[%s1002_s1 + $0x40] sm:$0xff]  ;;  %v276_v14 = vld [vmem:[%s1002_s1 + $0x48] sm:$0xff]  ;;  %v277_v16 = vld [vmem:[%s1002_s1 + $0x50] sm:$0xff]  ;;  %s445_s12 = sshll.u32 %s256_s28, 4  ;;  %s431_s7 = scalar_lea.sflag [#allocation4], %s869_s25  ;;  %s960_s12 = int_to_ptr.vmem [resolvable:$true] %s445_s12 }
  0x3d   : > { %556 = vmatprep.subr.bf16.mxu0 %v730_v0  ;;  %v287_v15 = vpack.c.bf16 %v276_v14, %v275_v13  ;;  %v278_v17 = vld [vmem:[%s1002_s1 + $0x58] sm:$0xff]  ;;  %v279_v19 = vld [vmem:[%s1002_s1 + $0x60] sm:$0xff]  ;;  %v280_v20 = vld [vmem:[%s1002_s1 + $0x68] sm:$0xff]  ;;  %v368_v62 = vsub.s32 0, %v367_v61  ;;  %s658_s9 = scalar_lea.vmem %s960_s12, 128  ;;  %p1014_p11 = scmp.ne.s32.totalorder %s1010_s30, 0 }
  0x3e   : > { %v288_v18 = vpack.c.bf16 %v278_v17, %v277_v16  ;;  %v289_v21 = vpack.c.bf16 %v280_v20, %v279_v19  ;;  %v281_v22 = vld [vmem:[%s1002_s1 + $0x70] sm:$0xff]  ;;  %v282_v23 = vld [vmem:[%s1002_s1 + $0x78] sm:$0xff]  ;;  %v265_v25 = vld [vmem:[%s1001_s0] sm:$0xff]  ;;  %p659_p10 = scmp.ne.s32.totalorder %s960_s12, %s658_s9 }
  0x3f   : > { %v290_v24 = vpack.c.bf16 %v282_v23, %v281_v22  ;;  %v266_v26 = vpack.c.bf16 %v265_v25, %v265_v25  ;;  %v341_v27 = vld [vmem:[%s873_s8 + $0x8] sm:$0xff]  ;;  %v343_v28 = vld [vmem:[%s873_s8 + $0x18] sm:$0xff]  ;;  %v340_v30 = vld [vmem:[%s873_s8] sm:$0xff] }
  0x40   : > { %557 = vmatpush3.bf16.msra.mxu0 %v284_v6  ;;  %v357_v29 = vpack.c.bf16 %v343_v28, %v341_v27  ;;  %v342_v31 = vld [vmem:[%s873_s8 + $0x10] sm:$0xff]  ;;  %v345_v33 = vld [vmem:[%s873_s8 + $0x28] sm:$0xff]  ;;  %v347_v34 = vld [vmem:[%s873_s8 + $0x38] sm:$0xff]  ;;  %p660_p12 = pnand %p659_p10, %p1014_p11 }
  0x41   : > { %558 = vmatprep.subr.bf16.mxu0 %v730_v0  ;;  %v356_v32 = vpack.c.bf16 %v342_v31, %v340_v30  ;;  %v359_v35 = vpack.c.bf16 %v347_v34, %v345_v33  ;;  %v344_v36 = vld [vmem:[%s873_s8 + $0x20] sm:$0xff]  ;;  %v346_v37 = vld [vmem:[%s873_s8 + $0x30] sm:$0xff]  ;;  %v349_v39 = vld [vmem:[%s873_s8 + $0x48] sm:$0xff] }
  0x42   : > { %380 = vmatprep.subr.bf16.mxu1 %v357_v29  ;;  %v358_v38 = vpack.c.bf16 %v346_v37, %v344_v36  ;;  %v351_v40 = vld [vmem:[%s873_s8 + $0x58] sm:$0xff]  ;;  %v348_v42 = vld [vmem:[%s873_s8 + $0x40] sm:$0xff]  ;;  %v350_v43 = vld [vmem:[%s873_s8 + $0x50] sm:$0xff]  ;;  %p661_p8 = pneg %p660_p12 }
  0x43   : > { %381 = vmatpush1.bf16.msra.mxu1 %v356_v32  ;;  %v361_v41 = vpack.c.bf16 %v351_v40, %v349_v39  ;;  %v360_v44 = vpack.c.bf16 %v350_v43, %v348_v42  ;;  %v353_v45 = vld [vmem:[%s873_s8 + $0x68] sm:$0xff]  ;;  %v355_v46 = vld [vmem:[%s873_s8 + $0x78] sm:$0xff]  ;;  %v352_v48 = vld [vmem:[%s873_s8 + $0x60] sm:$0xff] }
  0x44   : > { %559 = vmatpush3.bf16.msra.mxu0 %v285_v9  ;;  %382 = vmatprep.subr.bf16.mxu1 %v359_v35  ;;  %v363_v47 = vpack.c.bf16 %v355_v46, %v353_v45  ;;  %v354_v49 = vld [vmem:[%s873_s8 + $0x70] sm:$0xff]  ;;  %v534_v52 = vld [vmem:[%s1003_s2] ss:$0 sm:$0xff]  ;;  %s533_s8 = sshll.u32 %s785_s22, 1  ;;  %s733_s22 = smov [#allocation5]  }
  0x45   : > { %560 = vmatprep.subr.bf16.mxu0 %v730_v0  ;;  %v362_v50 = vpack.c.bf16 %v354_v49, %v352_v48  ;;  %p259_p6 = scmp.lt.s32.totalorder %s533_s8, 7  ;;  %s662_s10 = sshll.u32 %s733_s22, 4  ;;  %s663_s10 = int_to_ptr.vmem [resolvable:$false] %s662_s10 }
  0x46   : > { %s664_s29 = scalar_lea.vmem %s663_s10, 256  ;;  %p665_p9 = scmp.lt.s32.totalorder %s960_s12, %s663_s10 }
  0x47   : > { %383 = vmatpush1.bf16.msra.mxu1 %v358_v38  ;;  %s1021_s8 = smov (!%p259_p6, %s533_s8), 7  ;;  %p666_p0 = scmp.lt.s32.totalorder %s664_s29, %s658_s9 }
  0x48   : > { %561 = vmatpush3.bf16.msra.mxu0 %v286_v12  ;;  %384 = vmatprep.subr.bf16.mxu1 %v361_v41  ;;  %s261_s17 = scalar_lea.vmem %s1005_s4, %s1021_s8 }
  0x49   : > { %562 = vmatprep.subr.bf16.mxu0 %v730_v0  ;;  %v364_v63 = vld [vmem:[%s261_s17] sm:$0x3]  ;;  %p667_p2 = por %p666_p0, %p665_p9 }
  0x4a   : > { %v369_v1 = vrot.slane %v364_v63, %v368_v62 }
  0x4b   : > { %385 = vmatpush1.bf16.msra.mxu1 %v360_v44  ;;  %p668_p4 = pnand %p667_p2, %p661_p8 }
  0x4c   : > { %563 = vmatpush3.bf16.msra.mxu0 %v287_v15  ;;  %386 = vmatprep.subr.bf16.mxu1 %v363_v47 }
  0x4d   : > { %564 = vmatprep.subr.bf16.mxu0 %v730_v0 }
  0x4f   : > { %387 = vmatpush1.bf16.msra.mxu1 %v362_v50 }
  0x50   : > { %565 = vmatpush3.bf16.msra.mxu0 %v288_v18 }
  0x51   : > { %566 = vmatprep.subr.bf16.mxu0 %v730_v0 }
  0x54   : > { %567 = vmatpush3.bf16.msra.mxu0 %v289_v21 }
  0x55   : > { %568 = vmatprep.subr.bf16.mxu0 %v730_v0  ;;  %v372_v0 = vsub.s32 1, %v367_v61 }
  0x57   : > { %v373_v2 = vrot.slane %v364_v63, %v372_v0 }
  0x58   : > { %569 = vmatpush3.bf16.msra.mxu0 %v290_v24 }
  0x5b   : > { %571 = vmatmul.mubr.bf16.vlgmr.msra.gmra.mrb[0].mxu0 %v266_v26 }
 0x12e   : > { %v332_v53 = vpop.f32.mrb[0].mxu0 }
 0x12f   : > { %v333_v54 = vadd.f32 %v534_v52, %v332_v53  ;;  %v572_v55 = vpop.f32.mrb[1].mxu0 }
 0x130   : > { %v335_v56 = vpop.f32.mrb[2].mxu0 }
 0x131   : > { %626 = vtanh.f32 %v333_v54  ;;  %v573_v57 = vpop.f32.mrb[3].mxu0 }
 0x13b   : > { %v627_v58 = vpop.eup %626 }
 0x13c   : > { %v339_v59 = vpack.c.bf16 %v627_v58, %v627_v58 }
 0x13e   : > { %535 = vmatmul.mubr.msk.bf16.vlgmr.msra.gmra.mrb[0].mxu1 %vm376_vm1, %v339_v59 }
 0x211   : > { %v414_v3 = vpop.f32.mrb[0].mxu1 }
 0x212   : > { %v415_v4 = vadd.f32 %v414_v3, %v369_v1  ;;  %v416_v5 = vpop.f32.mrb[1].mxu1 }
 0x213   : > { %v417_v6 = vadd.f32 %v416_v5, %v373_v2  ;;  %v418_v7 = vpop.f32.mrb[2].mxu1 }
 0x214   : > { %v419_v8 = vpop.f32.mrb[3].mxu1 }
 0x215   : > { %v543_v9 = vpack.c.bf16 %v417_v6, %v415_v4 }
 0x217   : > { %429 = vst [vmem:[%s256_s28] sm:$0xff] %v543_v9 }
 0x218   : > { %671 = shalt.err (!%p668_p4)
}
 0x219   : > { %s672_s25 = scalar_lea.hbm %s958_s16, 128  ;;  %s676_s13 = scalar_lea.hbm %s1006_s5, 512 }
 0x21a   : > { %p673_p5 = scmp.ne.s32.totalorder %s958_s16, %s672_s25  ;;  %p677_p1 = scmp.lt.u32.totalorder %s958_s16, %s1006_s5 }
 0x21b   : > { %p678_p3 = scmp.lt.u32.totalorder %s676_s13, %s672_s25  ;;  %p680_p10 = scmp.lt.u32.totalorder %s672_s25, %s958_s16 }
 0x21c   : > { %p674_p7 = pnand %p673_p5, %p1014_p11 }
 0x21d   : > { %p679_p6 = por %p678_p3, %p677_p1 }
 0x21e   : > { %p675_p13 = pneg %p674_p7 }
 0x21f   : > { %p681_p12 = por %p680_p10, %p679_p6 }
 0x221   : > { %p682_p8 = pnand %p681_p12, %p675_p13 }
 0x223   : > { %685 = shalt.err (!%p682_p8)
}
 0x224   : > { %576 = dma.vmem_to_hbm [thread:$0]  (%p1014_p11), %s960_s12, 128, %s958_s16, %s431_s7  }
 0x225 PF: > { %p587_p9 = scmp.ge.s32.totalorder %s724_s21, 2  ;;  %s457_s26 = sand.u32 1, %s712_s18  }
 0x226   : > { %p1015_p0 = scmp.ne.s32.totalorder %s1011_s6, 0  ;;  %s458_s28 = scalar_lea.sflag [#allocation4], %s457_s26 }
 0x228   : > { %p583_p2 = pnand %p587_p9, %p1015_p0 }
 0x22a   : > { %707 = dma.done.wait (!%p583_p2), %s458_s28, 128  }
 0x22b   : > { %709 = vsyncadd (!%p583_p2), %s458_s28, 4294967168  ;;  %p18_p4 = scmp.ge.s32.totalorder %s789_s24, 6   ;;  %s1016_s18 = smov %s716_s19 }
 0x22c   : > { %s1017_s19 = smov %s720_s20  ;;  %s1018_s20 = smov %s801_s27 }
 0x22d   : > { %s1019_s21 = smov %s789_s24  ;;  %20 = sbr.rel (!%p18_p4) target bundleno = 5 (0x5), region = 88 }
 0x234   :  { %463 = vsyncpa [#allocation3], 1 }
 0x235   :  { %465 = vsyncpa [#allocation3 + $0x1], 1 }
 0x236   :  { %466 = vsyncpa [#allocation4], 1 }
 0x237   :  { %468 = vsyncpa [#allocation4 + $0x1], 1 }

</bundles_post_ra>
